<compile_context>
chip_gen: v5e
topology: v5e:2x2
jax: 0.10.0
libtpu: 0.0.40
codegen_flags: <defaults>
</compile_context>

<pallas_src>
import functools

import jax
import jax.numpy as jnp
from jax import lax
from jax.experimental import pallas as pl
from jax.experimental.pallas import tpu as pltpu


def _round_up(x: int, m: int) -> int:
    return (x + m - 1) // m * m


def _divisors(n: int):
    return [d for d in range(1, n + 1) if n % d == 0]


def _not_multiple_mask(idx, period: int, n_multiples: int):
    """True where int32 iota `idx` (in [0, period*n_multiples)) is NOT a multiple of `period`."""
    if period & (period - 1) == 0:                    # power of two: bitwise AND
        return (idx & (period - 1)) != 0
    if n_multiples <= 16:                             # short unrolled compare chain
        ok = idx != 0
        for k in range(1, n_multiples):
            ok = jnp.logical_and(ok, idx != k * period)
        return ok
    return (idx % period) != 0                        # general case


def _tv_loss_kernel(x_ref, out_ref, acc_h_ref, acc_w_ref, *,
                    lane_dense, H, W, chans_per_tile, use_roll_v, use_roll_h):
    t = pl.program_id(2)

    @pl.when(t == 0)
    def _init():
        acc_h_ref[...] = jnp.zeros_like(acc_h_ref)
        acc_w_ref[...] = jnp.zeros_like(acc_w_ref)

    x = x_ref[...].astype(jnp.float32)                # (rows, lanes)

    if lane_dense:
        # rows = whole channels, lanes = flattened (H, W).
        lane = lax.broadcasted_iota(jnp.int32, x.shape, 1)
        x_up = (pltpu.roll(x, shift=W, axis=1) if use_roll_v
                else jnp.concatenate([x[:, :W], x[:, :-W]], axis=1))
        x_left = (pltpu.roll(x, shift=1, axis=1) if use_roll_h
                  else jnp.concatenate([x[:, :1], x[:, :-1]], axis=1))
        hd = x - x_up
        wd = x - x_left
        hd2 = jnp.where(lane >= W, hd * hd, 0.0)                       # first image row
        wd2 = jnp.where(_not_multiple_mask(lane, W, H), wd * wd, 0.0)  # first column
    else:
        # rows = channel-aligned (C*H) rows, lanes = W.
        row = lax.broadcasted_iota(jnp.int32, x.shape, 0)
        x_up = (pltpu.roll(x, shift=1, axis=0) if use_roll_v
                else jnp.concatenate([x[:1, :], x[:-1, :]], axis=0))
        hd = x - x_up
        hd2 = jnp.where(_not_multiple_mask(row, H, chans_per_tile), hd * hd, 0.0)
        if use_roll_h:
            lane = lax.broadcasted_iota(jnp.int32, x.shape, 1)
            wd = x - pltpu.roll(x, shift=1, axis=1)
            wd2 = jnp.where(lane > 0, wd * wd, 0.0)
        else:
            wd = x - jnp.concatenate([x[:, :1], x[:, :-1]], axis=1)
            wd2 = wd * wd                              # column 0 diffs against itself -> 0

    # Few-vreg accumulators: per-step sublane reduce (VPU adds + tiny XLU tail),
    # per-lane partials stay resident; the single cross-lane reduce is in finalize.
    acc_h_ref[...] += jnp.sum(hd2, axis=0, keepdims=True)
    acc_w_ref[...] += jnp.sum(wd2, axis=0, keepdims=True)

    @pl.when(t == pl.num_programs(2) - 1)
    def _finalize():
        out_ref[0, 0, 0] = jnp.sum(acc_h_ref[...])
        out_ref[0, 0, 1] = jnp.sum(acc_w_ref[...])


def tv_loss(x, tv_loss_weight: float = 1.0):
    """Pallas TPU implementation of TVLoss.forward. x: (B, C, H, W) float."""
    assert x.ndim == 4
    B, C, H, W = x.shape
    assert H >= 2 and W >= 2, "TVLoss requires H >= 2 and W >= 2"
    itemsize = jnp.dtype(x.dtype).itemsize

    target_bytes = 4 * 1024 * 1024        # per streaming block (v7x-safe, big enough for v5e)
    lane_dense = W < 128

    if lane_dense:
        L = H * W
        lanes_pad = _round_up(L, 128)
        xr = x.reshape(B, C, L)
        n_rows_total = C

        def blk_bytes(rows):
            return _round_up(rows, 8) * lanes_pad * itemsize

        cands = [d for d in _divisors(C) if d % 8 == 0]
        good = [d for d in cands if blk_bytes(d) <= target_bytes]
        tile = max(good) if good else (min(cands) if cands else C)
        chans_per_tile = tile
        use_roll_v = use_roll_h = (L % 128 == 0)
    else:
        L = W
        lanes_pad = _round_up(W, 128)
        xr = x.reshape(B, C * H, W)
        n_rows_total = C * H

        def blk_bytes(rows):
            return _round_up(rows, 8) * lanes_pad * itemsize

        cands = [d * H for d in _divisors(C) if (d * H) % 8 == 0]
        good = [r for r in cands if blk_bytes(r) <= target_bytes]
        # TODO(synk): add an H-tiled one-row-halo path for a single huge
        # unaligned channel; the full-extent fallback can exceed v7x VMEM for
        # pathological shapes.
        tile = max(good) if good else (min(cands) if cands else C * H)
        chans_per_tile = tile // H
        use_roll_v = (tile % 8 == 0)
        use_roll_h = (W % 128 == 0)

    n_tiles = n_rows_total // tile

    # Feed v7x's second TensorCore even when B == 1 (no effect on v5e/v6e).
    P = 2 if (B == 1 and n_tiles >= 2 and n_tiles % 2 == 0) else 1
    T = n_tiles // P

    block_bytes = blk_bytes(tile)
    acc_bytes = 2 * 8 * lanes_pad * 4
    vmem_need = 2 * block_bytes + acc_bytes                    # double-buffered input + accs
    vmem_limit = int(min(100 * 1024 * 1024,
                         max(4 * 1024 * 1024, (vmem_need * 3) // 2 + (1 << 20))))

    total = B * C * H * W
    cost = pl.CostEstimate(flops=6 * total, transcendentals=0,
                           bytes_accessed=total * itemsize + B * P * 2 * 4)

    kernel = functools.partial(
        _tv_loss_kernel, lane_dense=lane_dense, H=H, W=W,
        chans_per_tile=chans_per_tile,
        use_roll_v=use_roll_v, use_roll_h=use_roll_h)

    partials = pl.pallas_call(
        kernel,
        out_shape=jax.ShapeDtypeStruct((B, P, 2), jnp.float32),
        grid_spec=pltpu.PrefetchScalarGridSpec(
            num_scalar_prefetch=0,
            grid=(B, P, T),
            in_specs=[
                pl.BlockSpec((None, tile, L), lambda b, p, t: (b, p * T + t, 0)),
            ],
            out_specs=pl.BlockSpec(
                (1, 1, 2), lambda b, p, t: (b, p, 0),
                memory_space=pltpu.MemorySpace.SMEM),
            scratch_shapes=[pltpu.VMEM((1, L), jnp.float32),
                            pltpu.VMEM((1, L), jnp.float32)],
        ),
        compiler_params=pltpu.CompilerParams(
            dimension_semantics=("parallel", "parallel", "arbitrary"),
            vmem_limit_bytes=vmem_limit),
        cost_estimate=cost,
    )(xr)

    # Trivial combine + normalization in plain JAX (matches the PyTorch module).
    count_h = C * (H - 1) * W
    count_w = C * H * (W - 1)
    h_tv = jnp.sum(partials[..., 0])
    w_tv = jnp.sum(partials[..., 1])
    return tv_loss_weight * 2.0 * (h_tv / count_h + w_tv / count_w) / B


def tv_loss_ref(x, tv_loss_weight: float = 1.0):
    """Pure-JAX reference mirroring the PyTorch module exactly."""
    B, C, H, W = x.shape
    count_h = C * (H - 1) * W
    count_w = C * H * (W - 1)
    h_tv = jnp.sum((x[:, :, 1:, :] - x[:, :, : H - 1, :]) ** 2)
    w_tv = jnp.sum((x[:, :, :, 1:] - x[:, :, :, : W - 1]) ** 2)
    return tv_loss_weight * 2.0 * (h_tv / count_h + w_tv / count_w) / B


if __name__ == "__main__":
    key = jax.random.PRNGKey(0)
    B, C, H, W = 2, 4, 16, 16
    x = jax.random.normal(key, (B, C, H, W), dtype=jnp.float32)

    out = jax.block_until_ready(tv_loss(x, tv_loss_weight=1.0))
    ref = jax.block_until_ready(tv_loss_ref(x, tv_loss_weight=1.0))
    assert jnp.allclose(out, ref, rtol=1e-5, atol=1e-5), (out, ref)

    print("KERNEL_OK")
</pallas_src>

<mosaic_0001>
module attributes {stable_mosaic.version = 11 : i64} {
  func.func @_tv_loss_kernel(%arg0: i32, %arg1: i32, %arg2: i32, %arg3: memref<1x4x256xf32, #tpu.memory_space<vmem>>, %arg4: memref<1x1x2xf32, #tpu.memory_space<smem>>, %arg5: memref<1x256xf32, #tpu.memory_space<vmem>>, %arg6: memref<1x256xf32, #tpu.memory_space<vmem>>) attributes {dimension_semantics = [#tpu.dimension_semantics<parallel>, #tpu.dimension_semantics<parallel>, #tpu.dimension_semantics<arbitrary>], iteration_bounds = array<i64: 2, 1, 1>, scalar_prefetch = 0 : i64, scratch_operands = 2 : i64, tpu.core_type = #tpu.core_type<tc>, window_params = [{transform_indices = @transform_0, window_bounds = array<i64: 1, 4, 256>}, {transform_indices = @transform_1, window_bounds = array<i64: 1, 1, 2>}]} {
    %c0_i32 = arith.constant 0 : i32
    %0 = arith.cmpi eq, %arg2, %c0_i32 : i32
    %1 = arith.extui %0 : i1 to i32
    %c0_i32_0 = arith.constant 0 : i32
    %2 = arith.cmpi ne, %1, %c0_i32_0 : i32
    scf.if %2 {
      %cst_18 = arith.constant 0.000000e+00 : f32
      %35 = vector.broadcast %cst_18 : f32 to vector<1x256xf32>
      %c0_19 = arith.constant 0 : index
      %c0_20 = arith.constant 0 : index
      %36 = vector.load %arg5[%c0_19, %c0_20] : memref<1x256xf32, #tpu.memory_space<vmem>>, vector<1x256xf32>
      tpu.vector_store %arg5[%c0_19, %c0_20], %35 {strides = array<i32>} : memref<1x256xf32, #tpu.memory_space<vmem>>, vector<1x256xf32>,
      %cst_21 = arith.constant 0.000000e+00 : f32
      %37 = vector.broadcast %cst_21 : f32 to vector<1x256xf32>
      %c0_22 = arith.constant 0 : index
      %c0_23 = arith.constant 0 : index
      %38 = vector.load %arg6[%c0_22, %c0_23] : memref<1x256xf32, #tpu.memory_space<vmem>>, vector<1x256xf32>
      tpu.vector_store %arg6[%c0_22, %c0_23], %37 {strides = array<i32>} : memref<1x256xf32, #tpu.memory_space<vmem>>, vector<1x256xf32>,
    } else {
    }
    %c0 = arith.constant 0 : index
    %c0_1 = arith.constant 0 : index
    %c0_2 = arith.constant 0 : index
    %3 = vector.load %arg3[%c0, %c0_1, %c0_2] : memref<1x4x256xf32, #tpu.memory_space<vmem>>, vector<1x4x256xf32>
    %4 = vector.shape_cast %3 : vector<1x4x256xf32> to vector<4x256xf32>
    %5 = tpu.iota {dimensions = array<i32: 1>} : vector<4x256xi32>
    %c16_i32 = arith.constant 16 : i32
    %6 = tpu.dynamic_rotate %4 by %c16_i32 dim 1 : vector<4x256xf32>, i32 -> vector<4x256xf32>
    %c1_i32 = arith.constant 1 : i32
    %7 = tpu.dynamic_rotate %4 by %c1_i32 dim 1 : vector<4x256xf32>, i32 -> vector<4x256xf32>
    %8 = arith.subf %4, %6 : vector<4x256xf32>
    %9 = arith.subf %4, %7 : vector<4x256xf32>
    %c16_i32_3 = arith.constant 16 : i32
    %10 = vector.broadcast %c16_i32_3 : i32 to vector<4x256xi32>
    %11 = arith.cmpi sge, %5, %10 : vector<4x256xi32>
    %12 = arith.mulf %8, %8 : vector<4x256xf32>
    %cst = arith.constant 0.000000e+00 : f32
    %13 = vector.broadcast %cst : f32 to vector<4x256xf32>
    %14 = arith.select %11, %12, %13 : vector<4x256xi1>, vector<4x256xf32>
    %c15_i32 = arith.constant 15 : i32
    %15 = vector.broadcast %c15_i32 : i32 to vector<4x256xi32>
    %16 = arith.andi %5, %15 : vector<4x256xi32>
    %c0_i32_4 = arith.constant 0 : i32
    %17 = vector.broadcast %c0_i32_4 : i32 to vector<4x256xi32>
    %18 = arith.cmpi ne, %16, %17 : vector<4x256xi32>
    %19 = arith.mulf %9, %9 : vector<4x256xf32>
    %cst_5 = arith.constant 0.000000e+00 : f32
    %20 = vector.broadcast %cst_5 : f32 to vector<4x256xf32>
    %21 = arith.select %18, %19, %20 : vector<4x256xi1>, vector<4x256xf32>
    %c0_6 = arith.constant 0 : index
    %c0_7 = arith.constant 0 : index
    %22 = vector.load %arg5[%c0_6, %c0_7] : memref<1x256xf32, #tpu.memory_space<vmem>>, vector<1x256xf32>
    %cst_8 = arith.constant dense<0.000000e+00> : vector<256xf32>
    %23 = vector.multi_reduction <add>, %14, %cst_8 [0] : vector<4x256xf32> to vector<256xf32>
    %24 = vector.shape_cast %23 : vector<256xf32> to vector<1x256xf32>
    %25 = arith.addf %22, %24 : vector<1x256xf32>
    %c0_9 = arith.constant 0 : index
    %c0_10 = arith.constant 0 : index
    %26 = vector.load %arg5[%c0_9, %c0_10] : memref<1x256xf32, #tpu.memory_space<vmem>>, vector<1x256xf32>
    tpu.vector_store %arg5[%c0_9, %c0_10], %25 {strides = array<i32>} : memref<1x256xf32, #tpu.memory_space<vmem>>, vector<1x256xf32>,
    %c0_11 = arith.constant 0 : index
    %c0_12 = arith.constant 0 : index
    %27 = vector.load %arg6[%c0_11, %c0_12] : memref<1x256xf32, #tpu.memory_space<vmem>>, vector<1x256xf32>
    %cst_13 = arith.constant dense<0.000000e+00> : vector<256xf32>
    %28 = vector.multi_reduction <add>, %21, %cst_13 [0] : vector<4x256xf32> to vector<256xf32>
    %29 = vector.shape_cast %28 : vector<256xf32> to vector<1x256xf32>
    %30 = arith.addf %27, %29 : vector<1x256xf32>
    %c0_14 = arith.constant 0 : index
    %c0_15 = arith.constant 0 : index
    %31 = vector.load %arg6[%c0_14, %c0_15] : memref<1x256xf32, #tpu.memory_space<vmem>>, vector<1x256xf32>
    tpu.vector_store %arg6[%c0_14, %c0_15], %30 {strides = array<i32>} : memref<1x256xf32, #tpu.memory_space<vmem>>, vector<1x256xf32>,
    %c0_i32_16 = arith.constant 0 : i32
    %32 = arith.cmpi eq, %arg2, %c0_i32_16 : i32
    %33 = arith.extui %32 : i1 to i32
    %c0_i32_17 = arith.constant 0 : i32
    %34 = arith.cmpi ne, %33, %c0_i32_17 : i32
    scf.if %34 {
      %c0_18 = arith.constant 0 : index
      %c0_19 = arith.constant 0 : index
      %35 = vector.load %arg5[%c0_18, %c0_19] : memref<1x256xf32, #tpu.memory_space<vmem>>, vector<1x256xf32>
      %36 = vector.shape_cast %35 : vector<1x256xf32> to vector<1x1x256xf32>
      %cst_20 = arith.constant dense<0.000000e+00> : vector<1xf32>
      %37 = vector.multi_reduction <add>, %36, %cst_20 [1, 2] : vector<1x1x256xf32> to vector<1xf32>
      %38 = vector.shape_cast %37 : vector<1xf32> to vector<1x1x1xf32>
      %39 = vector.extract %38[0, 0, 0] : f32 from vector<1x1x1xf32>
      %c0_21 = arith.constant 0 : index
      %c0_22 = arith.constant 0 : index
      %c0_23 = arith.constant 0 : index
      %40 = memref.load %arg4[%c0_21, %c0_22, %c0_23] : memref<1x1x2xf32, #tpu.memory_space<smem>>
      memref.store %39, %arg4[%c0_21, %c0_22, %c0_23] : memref<1x1x2xf32, #tpu.memory_space<smem>>
      %c0_24 = arith.constant 0 : index
      %c0_25 = arith.constant 0 : index
      %41 = vector.load %arg6[%c0_24, %c0_25] : memref<1x256xf32, #tpu.memory_space<vmem>>, vector<1x256xf32>
      %42 = vector.shape_cast %41 : vector<1x256xf32> to vector<1x1x256xf32>
      %cst_26 = arith.constant dense<0.000000e+00> : vector<1xf32>
      %43 = vector.multi_reduction <add>, %42, %cst_26 [1, 2] : vector<1x1x256xf32> to vector<1xf32>
      %44 = vector.shape_cast %43 : vector<1xf32> to vector<1x1x1xf32>
      %45 = vector.extract %44[0, 0, 0] : f32 from vector<1x1x1xf32>
      %c0_27 = arith.constant 0 : index
      %c0_28 = arith.constant 0 : index
      %c1 = arith.constant 1 : index
      %46 = memref.load %arg4[%c0_27, %c0_28, %c1] : memref<1x1x2xf32, #tpu.memory_space<smem>>
      memref.store %45, %arg4[%c0_27, %c0_28, %c1] : memref<1x1x2xf32, #tpu.memory_space<smem>>
    } else {
    }
    return
  }
  func.func @transform_0(%arg0: i32, %arg1: i32, %arg2: i32) -> (i32, i32, i32) {
    %c1_i32 = arith.constant 1 : i32
    %0 = arith.muli %arg1, %c1_i32 : i32
    %1 = arith.addi %0, %arg2 : i32
    %c0_i32 = arith.constant 0 : i32
    %c0_i32_0 = arith.constant 0 : i32
    return %arg0, %1, %c0_i32 : i32, i32, i32
  }
  func.func @transform_1(%arg0: i32, %arg1: i32, %arg2: i32) -> (i32, i32, i32) {
    %c0_i32 = arith.constant 0 : i32
    %c0_i32_0 = arith.constant 0 : i32
    return %arg0, %arg1, %c0_i32 : i32, i32, i32
  }
}

</mosaic_0001>

<bundles_post_ra>
// kernel: tpu_custom_call.1
= control target key start
LH: loop header
LB: loop body
LE: loop exit
PB: predicated region body
PF: predicated region fallthrough
CT: control target
= control target key end

     0   :  { %6 = vsyncpa [#allocation5], 0  ;;  %s771_s0 = inlined_call_operand.hbm [shape: f32[2,4,256], index: 0, kind: input, shape index: {}]   ;;  %s772_s1 = inlined_call_operand.hbm [shape: f32[2,1,2], index: 1, kind: output, shape index: {}]  }
   0x1   :  { %8 = vsyncpa [#allocation5 + $0x1], 0 }
   0x2   :  { %9 = vsyncpa [#allocation6], 0 }
   0x3   :  { %11 = vsyncpa [#allocation6 + $0x1], 0  ;;  %s623_s6 = smov 0   ;;  %s625_s7 = smov 0  }
   0x4   :  { %s627_s8 = smov 0   ;;  %s629_s9 = smov 0  }
   0x5   :  { %s631_s10 = smov 0   ;;  %s633_s11 = smov 0  }
   0x6 LB: > { %s432_s12 = sadd.s32 4294967295, %s608_s11   ;;  %s433_s13 = sadd.s32 4294967294, %s608_s11   ;;  %s608_s11 = sphi %s633_s11, %s17_s11   ;;  %s604_s10 = sphi %s631_s10, %s783_s10   ;;  %s600_s9 = sphi %s629_s9, %s782_s9   ;;  %s596_s8 = sphi %s627_s8, %s781_s8   ;;  %s592_s7 = sphi %s625_s7, %s780_s7   ;;  %s588_s6 = sphi %s623_s6, %s779_s6  }
   0x7   : > { %s36_s14 = sadd.s32 1, %s604_s10  ;;  %s47_s15 = sadd.s32 1, %s596_s8 }
   0x8   : > { %p38_p0 = scmp.ge.s32.totalorder %s36_s14, 2  ;;  %p54_p1 = scmp.ne.s32.totalorder %s596_s8, %s592_s7 }
   0x9   : > { %p55_p2 = scmp.eq.s32.totalorder %s608_s11, 0  ;;  %p60_p3 = scmp.ne.s32.totalorder %s592_s7, %s588_s6 }
   0xa   : > { %s785_s14 = smov (%p38_p0, %s36_s14), 0  ;;  %p61_p5 = scmp.eq.s32.totalorder %s432_s12, 0 }
   0xb   : > { %p664_p4 = por %p55_p2, %p54_p1  ;;  %s42_s17 = ssub.s32 %s604_s10, %s785_s14 }
   0xc   : > { %p86_p6 = scmp.eq.s32.totalorder %s432_s12, 1  ;;  %p45_p7 = scmp.eq.s32.totalorder %s42_s17, 0 }
   0xd   : > { %p670_p8 = por %p61_p5, %p60_p3  ;;  %p92_p10 = scmp.eq.s32.totalorder %s433_s13, 1 }
   0xe   : > { %p674_p9 = por %p86_p6, %p54_p1  ;;  %p458_p12 = scmp.lt.s32.totalorder %s608_s11, 2 }
   0xf   : > { %s679_s20 = scalar_select %p45_p7, %s596_s8, %s47_s15  }
  0x10   : > { %p681_p11 = por %p92_p10, %p60_p3  ;;  %s112_s22 = sand.u32 1, %s596_s8  }
  0x11   : > { %s436_s23 = sshll.u32 %s112_s22, 3  ;;  %s445_s24 = sshll.u32 %s604_s10, 3 }
  0x12   : > { %s124_s27 = scalar_lea.hbm %s771_s0, %s445_s24  ;;  %s116_s28 = scalar_lea.vmem [#allocation4], %s436_s23 }
  0x13   : > { %s128_s29 = sshll.u32 %s116_s28, 4  ;;  %s126_s30 = sshll.u32 %s124_s27, 4  ;;  %s129_s29 = int_to_ptr.vmem [resolvable:$true] %s128_s29  ;;  %s127_s30 = int_to_ptr.hbm [resolvable:$true] %s126_s30 }
  0x14   : > { %p455_p13 = pnand %p458_p12, %p664_p4  ;;  %p439_p0 = scmp.ge.s32.totalorder %s608_s11, 1 }
  0x15   : > { %p133_p1 = scmp.lt.s32.totalorder %s608_s11, 3  ;;  %s113_s2 = scalar_lea.sflag [#allocation5], %s112_s22 }
  0x16   : > { %457 = dma.hbm_to_vmem [thread:$0]  (!%p455_p13), %s127_s30, 128, %s129_s29, %s113_s2  }
  0x17   : > { %p134_p2 = pnand %p439_p0, %p133_p1 }
  0x18   : > { %s698_s3 = sand.u32 (!%p134_p2), 1, %s592_s7  }
  0x19   : > { %137 = sbr.rel (%p134_p2) target bundleno = 400 (0x190), region = 24  ;;  %s440_s4 = sshll.u32 (!%p134_p2), %s698_s3, 3 }
  0x1a   : > { %s140_s5 = scalar_lea.sflag (!%p134_p2), [#allocation5], %s698_s3  ;;  %s143_s12 = scalar_lea.vmem (!%p134_p2), [#allocation4], %s440_s4 }
  0x1e   : > { %579 = dma.done.wait (%p670_p8), %s140_s5, 128  }
  0x1f   : > { %581 = vsyncadd (%p670_p8), %s140_s5, 4294967168  ;;  %v174_v0 = vld [vmem:[%s143_s12] sm:$0xff]  ;;  %s610_s13 = smov 16   ;;  %s611_s15 = smov 1   ;;  %v168_v5 = vlaneseq  ;;  %v612_v7 = vmov 0.0   ;;  %vm206_vm2 = vcmask 1043456  }
  0x20   : > { %179 = vst [vmem:[#allocation1] ss:$2 sm:$0xff] %v174_v0  ;;  %vm258_vm7 = vcmask 1040384   ;;  %s441_s16 = sshll.u32 %s698_s3, 7  ;;  %s343_s24 = scalar_lea.hbm %s772_s1, %s600_s9 }
  0x21   : > { %vm706_vm0 = vcmp.lt.s32.totalorder %v168_v5, 256  ;;  %v176_v9 = vand.u32 127, %v168_v5  ;;  %s162_s18 = scalar_lea.smem [#allocation7], %s441_s16  ;;  %s345_s25 = sshll.u32 %s343_s24, 4  ;;  %s346_s25 = int_to_ptr.hbm [resolvable:$true] %s345_s25 }
  0x22   : > { %172 = vst.msk [vmem:[#allocation2] sm:$0x3] %vm706_vm0, %v612_v7  ;;  %s330_s26 = scalar_lea.smem %s162_s18, 1 [#allocation7]  ;;  %s333_s28 = scalar_lea.sflag [#allocation6], %s698_s3 }
  0x23   : > { %173 = vst.msk [vmem:[#allocation3] sm:$0x3] %vm706_vm0, %v612_v7  ;;  %vm188_vm1 = vcmp.lt.s32.totalorder %v176_v9, 16  ;;  %vm200_vm3 = vcmp.lt.s32.totalorder %v176_v9, 1  ;;  %v177_v24 = vadd.s32 128, %v176_v9  ;;  %vm216_vm4 = vcmp.ge.s32.totalorder %v176_v9, 16 }
  0x24   : > { %v227_v30 = vand.u32 15, %v176_v9  ;;  %s540_s29 = sshra.s32 %s346_s25, 4  ;;  %s546_s5 = scalar_lea.hbm %s772_s1, 2  ;;  %s541_s29 = int_to_ptr.hbm [resolvable:$true] %s540_s29 }
  0x25   : > { %v228_v31 = vand.u32 15, %v177_v24  ;;  %s542_s30 = scalar_lea.hbm %s541_s29, 1  ;;  %p547_p6 = scmp.lt.s32.totalorder %s541_s29, %s772_s1 }
  0x26   : > { %vm229_vm5 = vcmp.ne.s32.totalorder %v227_v30, 0  ;;  %p543_p3 = scmp.ne.s32.totalorder %s541_s29, %s542_s30  ;;  %p548_p7 = scmp.lt.s32.totalorder %s546_s5, %s542_s30 }
  0x27   : > { %v180_v1 = vld.sshfl [vmem:[#allocation1] sm:$0xff pattern:$0x75316420]  ;;  %v181_v2 = vld.sshfl [vmem:[#allocation1 + $0x8] sm:$0xff pattern:$0x75316420] }
  0x28   : > { %184 = vrot.lane.b32.xlu0 %v180_v1, %s610_s13  ;;  %191 = vst [vmem:[#allocation1] ss:$2 sm:$0xff] %v174_v0  ;;  %vm230_vm6 = vcmp.ne.s32.totalorder %v228_v31, 0  ;;  %p544_p4 = pnand %p543_p3, %p674_p9  ;;  %p549_p8 = por %p548_p7, %p547_p6 }
  0x29   : > { %v240_v55 = vld [vmem:[#allocation2] sm:$0x3] }
  0x2a   : > { %p545_p5 = pneg %p544_p4 }
  0x2c   : > { %p550_p10 = pnand %p549_p8, %p545_p5 }
  0x2f   : > { %v192_v3 = vld.sshfl [vmem:[#allocation1] sm:$0xff pattern:$0x75316420]  ;;  %v193_v4 = vld.sshfl [vmem:[#allocation1 + $0x8] sm:$0xff pattern:$0x75316420] }
  0x30   : > { %186 = vrot.lane.b32.xlu0 %v181_v2, %s610_s13  ;;  %196 = vrot.lane.b32.xlu1 %v192_v3, %s611_s15  ;;  %v267_v2 = vld [vmem:[#allocation3] sm:$0x3] }
  0x38   : > { %198 = vrot.lane.b32.xlu1 %v193_v4, %s611_s15 }
  0x9a   : > { %v185_v8 = vpop.permute.xlu0 %184 }
  0xa2   : > { %v187_v10 = vpop.permute.xlu0 %186  ;;  %v197_v11 = vpop.permute.xlu1 %196 }
  0xa3   : > { %v189_v12 = vsel %vm188_vm1, %v185_v8, %v187_v10  ;;  %v190_v14 = vsel %vm188_vm1, %v187_v10, %v185_v8 }
  0xa4   : > { %v205_v13 = vrot.slane %v189_v12, 4 }
  0xa6   : > { %v207_v15 = vsel %vm206_vm2, %v190_v14, %v205_v13 }
  0xa7   : > { %v209_v16 = vsub.f32 %v174_v0, %v207_v15 }
  0xa9   : > { %v218_v17 = vmul.f32 %v209_v16, %v209_v16 }
  0xaa   : > { %v199_v18 = vpop.permute.xlu1 %198 }
  0xab   : > { %220 = vst [vmem:[#allocation1] ss:$2 sm:$0xff] %v218_v17  ;;  %v201_v19 = vsel %vm200_vm3, %v197_v11, %v199_v18  ;;  %v202_v21 = vsel %vm200_vm3, %v199_v18, %v197_v11 }
  0xac   : > { %v212_v20 = vrot.slane %v201_v19, 4 }
  0xae   : > { %v213_v22 = vsel %vm206_vm2, %v202_v21, %v212_v20 }
  0xaf   : > { %v215_v23 = vsub.f32 %v174_v0, %v213_v22 }
  0xb1   : > { %v231_v25 = vmul.f32 %v215_v23, %v215_v23 }
  0xb2   : > { %v221_v26 = vld.sshfl [vmem:[#allocation1] sm:$0xff pattern:$0x75316420]  ;;  %v222_v27 = vld.sshfl [vmem:[#allocation1 + $0x8] sm:$0xff pattern:$0x75316420] }
  0xb3   : > { %v225_v28 = vsel %vm216_vm4, %v221_v26, 0.0  ;;  %v248_v29 = vsel %vm206_vm2, %v222_v27, 0.0  ;;  %233 = vst [vmem:[#allocation1] ss:$2 sm:$0xff] %v231_v25 }
  0xb4   : > { %v241_v32 = vsel %vm206_vm2, %v225_v28, 0.0  ;;  %v249_v33 = vrot.slane %v248_v29, 4 }
  0xb5   : > { %v242_v34 = vrot.slane %v241_v32, 4 }
  0xb6   : > { %v250_v35 = vadd.f32 %v249_v33, %v248_v29 }
  0xb7   : > { %v243_v36 = vadd.f32 %v242_v34, %v241_v32 }
  0xb8   : > { %v251_v37 = vrot.slane %v250_v35, 2 }
  0xb9   : > { %v244_v38 = vrot.slane %v243_v36, 2 }
  0xba   : > { %v252_v39 = vadd.f32 %v251_v37, %v250_v35  ;;  %v234_v40 = vld.sshfl [vmem:[#allocation1] sm:$0xff pattern:$0x75316420]  ;;  %v235_v41 = vld.sshfl [vmem:[#allocation1 + $0x8] sm:$0xff pattern:$0x75316420] }
  0xbb   : > { %v245_v42 = vadd.f32 %v244_v38, %v243_v36  ;;  %v238_v43 = vsel %vm229_vm5, %v234_v40, 0.0  ;;  %v239_v44 = vsel %vm230_vm6, %v235_v41, 0.0 }
  0xbc   : > { %v253_v45 = vrot.slane %v252_v39, 1  ;;  %v268_v46 = vsel %vm206_vm2, %v238_v43, 0.0  ;;  %v275_v47 = vsel %vm206_vm2, %v239_v44, 0.0 }
  0xbd   : > { %v246_v48 = vrot.slane %v245_v42, 1  ;;  %v269_v49 = vrot.slane %v268_v46, 4  ;;  %v276_v50 = vrot.slane %v275_v47, 4 }
  0xbe   : > { %v254_v51 = vadd.f32 %v253_v45, %v252_v39 }
  0xbf   : > { %v247_v52 = vadd.f32 %v246_v48, %v245_v42  ;;  %v270_v53 = vadd.f32 %v269_v49, %v268_v46  ;;  %v277_v54 = vadd.f32 %v276_v50, %v275_v47 }
  0xc0   : > { %v257_v56 = vrot.slane %v254_v51, 7 }
  0xc1   : > { %v271_v57 = vrot.slane %v270_v53, 2  ;;  %v278_v58 = vrot.slane %v277_v54, 2 }
  0xc2   : > { %v259_v59 = vsel %vm258_vm7, %v247_v52, %v257_v56 }
  0xc3   : > { %v261_v60 = vadd.f32 %v259_v59, %v240_v55  ;;  %v272_v61 = vadd.f32 %v271_v57, %v270_v53  ;;  %v279_v62 = vadd.f32 %v278_v58, %v277_v54 }
  0xc5   : > { %266 = vst.msk [vmem:[#allocation2] sm:$0x3] %vm706_vm0, %v261_v60  ;;  %v273_v63 = vrot.slane %v272_v61, 1  ;;  %v280_v0 = vrot.slane %v279_v62, 1 }
  0xc7   : > { %v281_v1 = vadd.f32 %v280_v0, %v279_v62  ;;  %v274_v3 = vadd.f32 %v273_v63, %v272_v61 }
  0xc9   : > { %v284_v4 = vrot.slane %v281_v1, 7 }
  0xcb   : > { %v285_v5 = vsel %vm258_vm7, %v274_v3, %v284_v4 }
  0xcc   : > { %v287_v7 = vadd.f32 %v285_v5, %v267_v2  ;;  %v292_v8 = vld [vmem:[#allocation2] sm:$0x3] }
  0xcd   : > { %v294_v9 = vperm.slane %v292_v8, 0  ;;  %v295_v10 = vperm.slane %v292_v8, 1 }
  0xce   : > { %288 = vst.msk [vmem:[#allocation3] sm:$0x3] %vm706_vm0, %v287_v7 }
  0xcf   : > { %v298_v11 = vsel %vm258_vm7, %v294_v9, 0.0  ;;  %v299_v12 = vsel %vm258_vm7, %v295_v10, 0.0 }
  0xd0   : > { %v300_v13 = vadd.f32 %v299_v12, %v298_v11 }
  0xd2   : > { %301 = vadd.xlane.f32.xlu2 %v300_v13 }
  0xd5   : > { %v312_v14 = vld [vmem:[#allocation3] sm:$0x3] }
  0xd6   : > { %v314_v15 = vperm.slane %v312_v14, 0  ;;  %v315_v16 = vperm.slane %v312_v14, 1 }
  0xd8   : > { %v318_v17 = vsel %vm258_vm7, %v314_v15, 0.0  ;;  %v319_v18 = vsel %vm258_vm7, %v315_v16, 0.0 }
  0xd9   : > { %v320_v19 = vadd.f32 %v319_v18, %v318_v17 }
  0xdb   : > { %321 = vadd.xlane.f32.xlu2 %v320_v19 }
 0x145   : > { %v302_v20 = vpop.xlane.xlu2 %301 }
 0x146   : > { %v303_v21 = vrot.slane %v302_v20, 4 }
 0x148   : > { %v304_v6 = vadd.f32 %v303_v21, %v302_v20 }
 0x14a   : > { %v305_v22 = vrot.slane %v304_v6, 2 }
 0x14c   : > { %v306_v23 = vadd.f32 %v305_v22, %v304_v6 }
 0x14e   : > { %v322_v24 = vpop.xlane.xlu2 %321  ;;  %v307_v25 = vrot.slane %v306_v23, 1 }
 0x14f   : > { %v323_v26 = vrot.slane %v322_v24, 4 }
 0x150   : > { %v308_v27 = vadd.f32 %v307_v25, %v306_v23 }
 0x151   : > { %v324_v28 = vadd.f32 %v323_v26, %v322_v24 }
 0x152   : > { %446 = vpush %v308_v27 }
 0x153   : > { %v325_v29 = vrot.slane %v324_v28, 2 }
 0x155   : > { %v326_v30 = vadd.f32 %v325_v29, %v324_v28 }
 0x157   : > { %v327_v31 = vrot.slane %v326_v30, 1 }
 0x159   : > { %v328_v32 = vadd.f32 %v327_v31, %v326_v30 }
 0x15b   : > { %448 = vpush %v328_v32 }
 0x183   : > { %s447_s17 = spop %446 }
 0x184   : > { %311 = sst [smem:[%s162_s18]] %s447_s17 }
 0x18c   : > { %s449_s27 = spop %448 }
 0x18d   : > { %331 = sst [smem:[%s330_s26]] %s449_s27 }
 0x18e   : > { %553 = shalt.err (!%p550_p10)
}
 0x18f   : > { %452 = dma.smem_to_hbm (%p674_p9), %s162_s18, 16, %s346_s25, %s333_s28  }
 0x190 PF: > { %352 = sbr.rel (%p458_p12) target bundleno = 408 (0x198), region = 44  ;;  %s357_s9 = sand.u32 (!%p458_p12), 1, %s588_s6  }
 0x191   : > { %s358_s3 = scalar_lea.sflag (!%p458_p12), [#allocation6], %s357_s9 }
 0x195   : > { %583 = dma.done.wait (%p681_p11), %s358_s3, 16  }
 0x196   : > { %585 = vsyncadd (%p681_p11), %s358_s3, 4294967280 }
 0x197   : > { %364 = sfence }
 0x198 PF: > { %s17_s11 = sadd.s32 1, %s608_s11   ;;  %s779_s6 = smov %s592_s7 }
 0x199   : > { %p14_p13 = scmp.ge.s32.totalorder %s17_s11, 4   ;;  %s780_s7 = smov %s596_s8 }
 0x19a   : > { %s781_s8 = smov %s679_s20  ;;  %s782_s9 = smov %s604_s10 }
 0x19b   : > { %s783_s10 = smov %s785_s14  ;;  %16 = sbr.rel (!%p14_p13) target bundleno = 6 (0x6), region = 79 }
 0x1a0   :  { %365 = vsyncpa [#allocation5], 1 }
 0x1a1   :  { %367 = vsyncpa [#allocation5 + $0x1], 1 }
 0x1a2   :  { %368 = vsyncpa [#allocation6], 1 }
 0x1a3   :  { %370 = vsyncpa [#allocation6 + $0x1], 1 }

</bundles_post_ra>
